<compile_context>
chip_gen: v7x
topology: tpu7x:2x2x1
jax: 0.10.0
libtpu: 0.0.40
codegen_flags: <defaults>
</compile_context>

<pallas_src>
import functools
import math

import numpy as np
import jax
import jax.numpy as jnp
from jax.experimental import pallas as pl
from jax.experimental.pallas import tpu as pltpu


def _round_up(x, m):
    return ((x + m - 1) // m) * m


def _device_kind():
    try:
        return jax.devices()[0].device_kind.lower()
    except Exception:
        return ""


def _vmem_capacity_bytes():
    try:
        info = pltpu.get_tpu_info()
        for name in ("vmem_capacity_bytes", "vmem_size_bytes", "vmem_bytes"):
            cap = getattr(info, name, None)
            if cap:
                return int(cap)
    except Exception:
        pass
    kind = _device_kind()
    if ("v7" in kind) or ("7x" in kind):
        return 64 * 2**20
    return 128 * 2**20


def _gelu(h, approx):
    if approx:
        # tanh approximation -> EUP slot (otherwise idle); not bit-exact with
        # torch.nn.GELU() default.
        c = jnp.float32(math.sqrt(2.0 / math.pi))
        return 0.5 * h * (1.0 + jnp.tanh(c * (h + 0.044715 * (h * h * h))))
    # exact GELU: 0.5*x*(1+erf(x/sqrt(2))) == torch.nn.GELU() default
    return 0.5 * h * (1.0 + jax.lax.erf(h * jnp.float32(1.0 / math.sqrt(2.0))))


def _ffn_kernel_single(x_ref, w1_ref, b1_ref, w2_ref, b2_ref, o_ref, *,
                       approx_gelu):
    # Whole hidden dim in one tile: no accumulator, write output directly.
    h = jnp.dot(x_ref[...], w1_ref[...], preferred_element_type=jnp.float32)
    h = _gelu(h + b1_ref[...], approx_gelu)
    out = jnp.dot(h.astype(w2_ref.dtype), w2_ref[...],
                  preferred_element_type=jnp.float32)
    o_ref[...] = (out + b2_ref[...]).astype(o_ref.dtype)


def _ffn_kernel_multi(x_ref, w1_ref, b1_ref, w2_ref, b2_ref, o_ref, acc_ref, *,
                      approx_gelu):
    # Grid: (row tiles [parallel], hidden tiles [arbitrary]).  The output /
    # accumulator block index is constant along the hidden axis, so acc_ref
    # carries the partial second matmul across hidden tiles.
    h_idx = pl.program_id(1)

    @pl.when(h_idx == 0)
    def _init():
        acc_ref[...] = jnp.zeros_like(acc_ref)

    h = jnp.dot(x_ref[...], w1_ref[...], preferred_element_type=jnp.float32)
    h = _gelu(h + b1_ref[...], approx_gelu)
    acc_ref[...] += jnp.dot(h.astype(w2_ref.dtype), w2_ref[...],
                            preferred_element_type=jnp.float32)

    @pl.when(h_idx == pl.num_programs(1) - 1)
    def _finalize():
        o_ref[...] = (acc_ref[...] + b2_ref[...]).astype(o_ref.dtype)


def prepare_feed_forward_params(w1, b1, w2, b2, *,
                                compute_dtype=jnp.bfloat16):
    """Pad feature/hidden axes to lane (128) multiples and cast ONCE at init.

    Weights are stored (in, out) for x @ W.  Weights end up in `compute_dtype`
    (bf16 default -> half the weight DMA, full-rate MXU); biases stay f32."""
    dim, hidden = w1.shape
    dim_p = _round_up(dim, 128)
    hidden_p = _round_up(hidden, 128)
    if dim_p != dim or hidden_p != hidden:
        w1 = jnp.pad(w1, ((0, dim_p - dim), (0, hidden_p - hidden)))
        w2 = jnp.pad(w2, ((0, hidden_p - hidden), (0, dim_p - dim)))
        b1 = jnp.pad(b1, (0, hidden_p - hidden))
        b2 = jnp.pad(b2, (0, dim_p - dim))
    w1 = w1.astype(compute_dtype)
    w2 = w2.astype(compute_dtype)
    b1 = b1.reshape(1, hidden_p).astype(jnp.float32)
    b2 = b2.reshape(1, dim_p).astype(jnp.float32)
    return w1, b1, w2, b2


@functools.partial(
    jax.jit, static_argnames=("block_rows", "block_hidden", "approx_gelu"))
def feed_forward(x, w1, b1, w2, b2, *, block_rows=None, block_hidden=None,
                 approx_gelu=None):
    """GELU(x @ W1 + b1) @ W2 + b2.  x: (..., dim); params from
    prepare_feed_forward_params (pre-padded, weights in compute dtype)."""
    orig_shape = x.shape
    orig_dtype = x.dtype
    dim = x.shape[-1]
    dim_p, hidden_p = w1.shape
    c_dtype = w1.dtype
    c_bytes = np.dtype(c_dtype).itemsize
    out_bytes = np.dtype(orig_dtype).itemsize

    if approx_gelu is None:
        # tanh GELU is ~free (EUP slot); keep exact erf for the f32 parity path.
        approx_gelu = bool(np.dtype(c_dtype) == np.dtype(jnp.bfloat16))

    # ---- generation-aware defaults ------------------------------------------
    kind = _device_kind()
    is_v7 = ("v7" in kind) or ("7x" in kind)
    mxu_rows = 128 if "v5" in kind else 256
    if block_rows is None:
        block_rows = 256 if is_v7 else 512
    if block_hidden is None:
        block_hidden = 512 if is_v7 else 1024

    cap = _vmem_capacity_bytes()
    if is_v7:
        cap = min(cap, 64 * 2**20)          # per-TensorCore physical VMEM
    budget = int(0.75 * cap)                # <= 48 MiB on v7x, 96 MiB on v5e/v6e

    # ---- flatten rows, pad the feature axis only if not lane aligned --------
    x2d = x.reshape(-1, dim)
    n = x2d.shape[0]
    if dim_p != dim:
        x2d = jnp.pad(x2d, ((0, 0), (0, dim_p - dim)))
    x2d = x2d.astype(c_dtype)

    # ---- tile sizes ----------------------------------------------------------
    n8 = _round_up(n, 8)
    if n8 <= mxu_rows:
        tm = n8                                             # single small tile
    else:
        tm = min(_round_up(block_rows, mxu_rows), _round_up(n, mxu_rows))

    def hidden_tile(max_th):                                # must divide hidden_p
        th_ = min(_round_up(max_th, 128), hidden_p)
        while hidden_p % th_:
            th_ -= 128
        return th_

    th = hidden_tile(block_hidden)

    def vmem_est(tm_, th_):
        est = (2 * tm_ * dim_p * c_bytes        # x tiles (double buffered)
               + 2 * tm_ * dim_p * out_bytes    # out tiles
               + 2 * dim_p * th_ * c_bytes      # W1 tiles
               + 2 * th_ * dim_p * c_bytes      # W2 tiles
               + 2 * 8 * (th_ + dim_p) * 4      # biases (sublane padded)
               + tm_ * th_ * 4                  # f32 hidden intermediate
               + tm_ * dim_p * 4)               # f32 second-dot result
        if hidden_p // th_ > 1:
            est += tm_ * dim_p * 4              # accumulator scratch
        return est

    # auto-shrink tiles until they fit the per-generation budget
    while vmem_est(tm, th) > budget:
        if th > 128:
            th = hidden_tile(max(128, th // 2))
        elif tm > mxu_rows:
            tm = max(mxu_rows, _round_up(tm // 2, mxu_rows))
        elif tm > 8:
            tm = max(8, _round_up(tm // 2, 8))
        else:
            break

    n_row_tiles = pl.cdiv(n, tm)
    n_hid_tiles = hidden_p // th
    vmem_limit = int(min(budget, max(2 * vmem_est(tm, th), 32 * 2**20)))

    if n_hid_tiles == 1:
        # Fast path: weights fully resident (constant block index), no
        # accumulator, direct store.
        kernel = functools.partial(_ffn_kernel_single, approx_gelu=approx_gelu)
        grid = (n_row_tiles,)
        in_specs = [
            pl.BlockSpec((tm, dim_p), lambda i: (i, 0)),          # x rows
            pl.BlockSpec((dim_p, hidden_p), lambda i: (0, 0)),    # W1 (resident)
            pl.BlockSpec((1, hidden_p), lambda i: (0, 0)),        # b1
            pl.BlockSpec((hidden_p, dim_p), lambda i: (0, 0)),    # W2 (resident)
            pl.BlockSpec((1, dim_p), lambda i: (0, 0)),           # b2
        ]
        out_specs = pl.BlockSpec((tm, dim_p), lambda i: (i, 0))
        scratch_shapes = []
        dim_sem = ("parallel",)
    else:
        kernel = functools.partial(_ffn_kernel_multi, approx_gelu=approx_gelu)
        grid = (n_row_tiles, n_hid_tiles)
        in_specs = [
            pl.BlockSpec((tm, dim_p), lambda i, h: (i, 0)),       # x rows
            pl.BlockSpec((dim_p, th), lambda i, h: (0, h)),       # W1 hidden tile
            pl.BlockSpec((1, th), lambda i, h: (0, h)),           # b1 hidden tile
            pl.BlockSpec((th, dim_p), lambda i, h: (h, 0)),       # W2 hidden tile
            pl.BlockSpec((1, dim_p), lambda i, h: (0, 0)),        # b2
        ]
        out_specs = pl.BlockSpec((tm, dim_p), lambda i, h: (i, 0))
        scratch_shapes = [pltpu.VMEM((tm, dim_p), jnp.float32)]
        dim_sem = ("parallel", "arbitrary")   # reduction axis last

    out = pl.pallas_call(
        kernel,
        out_shape=jax.ShapeDtypeStruct((n, dim_p), orig_dtype),
        grid_spec=pltpu.PrefetchScalarGridSpec(
            num_scalar_prefetch=0,
            grid=grid,
            in_specs=in_specs,
            out_specs=out_specs,
            scratch_shapes=scratch_shapes,
        ),
        compiler_params=pltpu.CompilerParams(
            dimension_semantics=dim_sem,
            vmem_limit_bytes=vmem_limit,
        ),
    )(x2d, w1, b1, w2, b2)

    if dim_p != dim:
        out = out[:, :dim]
    return out.reshape(orig_shape)


def init_feed_forward_params(key, dim, hidden_dim, dtype=jnp.float32):
    """Init mirroring torch.nn.Linear defaults (uniform +-1/sqrt(fan_in)).
    Weights stored as (in, out) for x @ W."""
    k1, k2, k3, k4 = jax.random.split(key, 4)
    bound1 = 1.0 / math.sqrt(dim)
    bound2 = 1.0 / math.sqrt(hidden_dim)
    w1 = jax.random.uniform(k1, (dim, hidden_dim), dtype, -bound1, bound1)
    b1 = jax.random.uniform(k2, (hidden_dim,), dtype, -bound1, bound1)
    w2 = jax.random.uniform(k3, (hidden_dim, dim), dtype, -bound2, bound2)
    b2 = jax.random.uniform(k4, (dim,), dtype, -bound2, bound2)
    return w1, b1, w2, b2


def _reference(x, w1, b1, w2, b2, compute_dtype=jnp.float32, approx_gelu=False):
    cd = compute_dtype
    h = jnp.dot(x.astype(cd), w1.astype(cd),
                preferred_element_type=jnp.float32) + b1.astype(jnp.float32)
    if approx_gelu:
        c = jnp.float32(math.sqrt(2.0 / math.pi))
        h = 0.5 * h * (1.0 + jnp.tanh(c * (h + 0.044715 * h * h * h)))
    else:
        h = 0.5 * h * (1.0 + jax.lax.erf(h * jnp.float32(1.0 / math.sqrt(2.0))))
    out = jnp.dot(h.astype(cd), w2.astype(cd),
                  preferred_element_type=jnp.float32) + b2.astype(jnp.float32)
    return out.astype(x.dtype)


if __name__ == "__main__":
    key = jax.random.PRNGKey(0)
    k1, k2, k3, k4 = jax.random.split(key, 4)

    # ---- config 1: small shapes implied by the module -----------------------
    # x: (batch, cavs, H, W, dim) with dim=32, mlp_dim=64 (one FeedForward).
    B, L, H, W, dim, mlp_dim = 2, 3, 4, 4, 32, 64
    x = jax.random.normal(k1, (B, L, H, W, dim), dtype=jnp.float32)
    w1, b1, w2, b2 = init_feed_forward_params(k2, dim, mlp_dim)

    # Default path: bf16 MXU inputs + tanh GELU + f32 accumulation.
    p_bf16 = prepare_feed_forward_params(w1, b1, w2, b2)           # bf16 default
    out = jax.block_until_ready(feed_forward(x, *p_bf16))
    ref_bf16 = _reference(x.reshape(-1, dim), w1, b1, w2, b2,
                          compute_dtype=jnp.bfloat16,
                          approx_gelu=True).reshape(x.shape)
    assert out.shape == x.shape and out.dtype == x.dtype
    assert jnp.allclose(out, ref_bf16, atol=2e-2, rtol=2e-2)

    # Exact path: f32 weights, erf GELU (torch.nn.GELU parity).
    p_f32 = prepare_feed_forward_params(w1, b1, w2, b2, compute_dtype=jnp.float32)
    out_f32 = jax.block_until_ready(feed_forward(x, *p_f32, approx_gelu=False))
    ref_f32 = _reference(x.reshape(-1, dim), w1, b1, w2, b2).reshape(x.shape)
    assert out_f32.shape == x.shape and out_f32.dtype == x.dtype
    assert jnp.allclose(out_f32, ref_f32, atol=2e-3, rtol=2e-3)

    # ---- config 2: exercises hidden-axis accumulation + ragged row count ----
    dim2, mlp2 = 128, 512
    x2 = jax.random.normal(k3, (2, 68, dim2), dtype=jnp.float32)   # 136 rows
    raw2 = init_feed_forward_params(k4, dim2, mlp2)
    p2 = prepare_feed_forward_params(*raw2, compute_dtype=jnp.float32)
    out2 = jax.block_until_ready(
        feed_forward(x2, *p2, block_rows=64, block_hidden=128, approx_gelu=False))
    ref2 = _reference(x2.reshape(-1, dim2), *raw2).reshape(x2.shape)
    assert out2.shape == x2.shape and out2.dtype == x2.dtype
    assert jnp.allclose(out2, ref2, atol=2e-3, rtol=2e-3)

    print("KERNEL_OK")
</pallas_src>

<mosaic_0001>
module attributes {stable_mosaic.version = 11 : i64} {
  func.func @_ffn_kernel_single(%arg0: i32, %arg1: memref<96x128xbf16, #tpu.memory_space<vmem>>, %arg2: memref<128x128xbf16, #tpu.memory_space<vmem>>, %arg3: memref<1x128xf32, #tpu.memory_space<vmem>>, %arg4: memref<128x128xbf16, #tpu.memory_space<vmem>>, %arg5: memref<1x128xf32, #tpu.memory_space<vmem>>, %arg6: memref<96x128xf32, #tpu.memory_space<vmem>>) attributes {dimension_semantics = [#tpu.dimension_semantics<parallel>], iteration_bounds = array<i64: 1>, scalar_prefetch = 0 : i64, scratch_operands = 0 : i64, tpu.core_type = #tpu.core_type<tc>, window_params = [{transform_indices = @transform_0, window_bounds = array<i64: 96, 128>}, {pipeline_mode = #tpu.pipeline_mode<synchronous>, transform_indices = @transform_1, window_bounds = array<i64: 128, 128>}, {pipeline_mode = #tpu.pipeline_mode<synchronous>, transform_indices = @transform_2, window_bounds = array<i64: 1, 128>}, {pipeline_mode = #tpu.pipeline_mode<synchronous>, transform_indices = @transform_3, window_bounds = array<i64: 128, 128>}, {pipeline_mode = #tpu.pipeline_mode<synchronous>, transform_indices = @transform_4, window_bounds = array<i64: 1, 128>}, {transform_indices = @transform_5, window_bounds = array<i64: 96, 128>}]} {
    %c0 = arith.constant 0 : index
    %c0_0 = arith.constant 0 : index
    %0 = vector.load %arg1[%c0, %c0_0] : memref<96x128xbf16, #tpu.memory_space<vmem>>, vector<96x128xbf16>
    %c0_1 = arith.constant 0 : index
    %c0_2 = arith.constant 0 : index
    %1 = vector.load %arg2[%c0_1, %c0_2] : memref<128x128xbf16, #tpu.memory_space<vmem>>, vector<128x128xbf16>
    %cst = arith.constant dense<0.000000e+00> : vector<96x128xf32>
    %2 = tpu.matmul %0, %1, %cst {dimension_numbers = #tpu.dot_dimension_numbers<[1], [0], [0], [1], [0, 0, 1, 1], [], []>} : vector<96x128xbf16>, vector<128x128xbf16>, vector<96x128xf32> -> vector<96x128xf32>
    %c0_3 = arith.constant 0 : index
    %c0_4 = arith.constant 0 : index
    %3 = vector.load %arg3[%c0_3, %c0_4] : memref<1x128xf32, #tpu.memory_space<vmem>>, vector<1x128xf32>
    %4 = vector.broadcast %3 : vector<1x128xf32> to vector<96x128xf32>
    %5 = arith.addf %2, %4 : vector<96x128xf32>
    %cst_5 = arith.constant 5.000000e-01 : f32
    %6 = vector.broadcast %cst_5 : f32 to vector<96x128xf32>
    %7 = arith.mulf %6, %5 : vector<96x128xf32>
    %8 = arith.mulf %5, %5 : vector<96x128xf32>
    %9 = arith.mulf %8, %5 : vector<96x128xf32>
    %cst_6 = arith.constant 4.471500e-02 : f32
    %10 = vector.broadcast %cst_6 : f32 to vector<96x128xf32>
    %11 = arith.mulf %10, %9 : vector<96x128xf32>
    %12 = arith.addf %5, %11 : vector<96x128xf32>
    %cst_7 = arith.constant 0.797884583 : f32
    %13 = vector.broadcast %cst_7 : f32 to vector<96x128xf32>
    %14 = arith.mulf %13, %12 : vector<96x128xf32>
    %15 = math.tanh %14 : vector<96x128xf32>
    %cst_8 = arith.constant 1.000000e+00 : f32
    %16 = vector.broadcast %cst_8 : f32 to vector<96x128xf32>
    %17 = arith.addf %16, %15 : vector<96x128xf32>
    %18 = arith.mulf %7, %17 : vector<96x128xf32>
    %19 = arith.truncf %18 : vector<96x128xf32> to vector<96x128xbf16>
    %c0_9 = arith.constant 0 : index
    %c0_10 = arith.constant 0 : index
    %20 = vector.load %arg4[%c0_9, %c0_10] : memref<128x128xbf16, #tpu.memory_space<vmem>>, vector<128x128xbf16>
    %cst_11 = arith.constant dense<0.000000e+00> : vector<96x128xf32>
    %21 = tpu.matmul %19, %20, %cst_11 {dimension_numbers = #tpu.dot_dimension_numbers<[1], [0], [0], [1], [0, 0, 1, 1], [], []>} : vector<96x128xbf16>, vector<128x128xbf16>, vector<96x128xf32> -> vector<96x128xf32>
    %c0_12 = arith.constant 0 : index
    %c0_13 = arith.constant 0 : index
    %22 = vector.load %arg5[%c0_12, %c0_13] : memref<1x128xf32, #tpu.memory_space<vmem>>, vector<1x128xf32>
    %23 = vector.broadcast %22 : vector<1x128xf32> to vector<96x128xf32>
    %24 = arith.addf %21, %23 : vector<96x128xf32>
    %c0_14 = arith.constant 0 : index
    %c0_15 = arith.constant 0 : index
    %25 = vector.load %arg6[%c0_14, %c0_15] : memref<96x128xf32, #tpu.memory_space<vmem>>, vector<96x128xf32>
    tpu.vector_store %arg6[%c0_14, %c0_15], %24 {strides = array<i32>} : memref<96x128xf32, #tpu.memory_space<vmem>>, vector<96x128xf32>,
    return
  }
  func.func @transform_0(%arg0: i32) -> (i32, i32) {
    %c0_i32 = arith.constant 0 : i32
    %c0_i32_0 = arith.constant 0 : i32
    return %arg0, %c0_i32 : i32, i32
  }
  func.func @transform_1(%arg0: i32) -> (i32, i32) {
    %c0_i32 = arith.constant 0 : i32
    %c0_i32_0 = arith.constant 0 : i32
    %c0_i32_1 = arith.constant 0 : i32
    return %c0_i32, %c0_i32_0 : i32, i32
  }
  func.func @transform_2(%arg0: i32) -> (i32, i32) {
    %c0_i32 = arith.constant 0 : i32
    %c0_i32_0 = arith.constant 0 : i32
    %c0_i32_1 = arith.constant 0 : i32
    return %c0_i32, %c0_i32_0 : i32, i32
  }
  func.func @transform_3(%arg0: i32) -> (i32, i32) {
    %c0_i32 = arith.constant 0 : i32
    %c0_i32_0 = arith.constant 0 : i32
    %c0_i32_1 = arith.constant 0 : i32
    return %c0_i32, %c0_i32_0 : i32, i32
  }
  func.func @transform_4(%arg0: i32) -> (i32, i32) {
    %c0_i32 = arith.constant 0 : i32
    %c0_i32_0 = arith.constant 0 : i32
    %c0_i32_1 = arith.constant 0 : i32
    return %c0_i32, %c0_i32_0 : i32, i32
  }
  func.func @transform_5(%arg0: i32) -> (i32, i32) {
    %c0_i32 = arith.constant 0 : i32
    %c0_i32_0 = arith.constant 0 : i32
    return %arg0, %c0_i32 : i32, i32
  }
}

</mosaic_0001>

<bundles_post_ra>
// kernel: feed_forward.1
= control target key start
LH: loop header
LB: loop body
LE: loop exit
PB: predicated region body
PF: predicated region fallthrough
CT: control target
= control target key end

     0   :  { %s912_s0 = inlined_call_operand.vmem [shape: bf16[96,128], index: 0, kind: input, shape index: {}]   ;;  %s913_s1 = inlined_call_operand.vmem [shape: bf16[128,128], index: 1, kind: input, shape index: {}]   ;;  %s914_s2 = inlined_call_operand.vmem [shape: f32[1,128], index: 2, kind: input, shape index: {}]   ;;  %s915_s3 = inlined_call_operand.vmem [shape: bf16[128,128], index: 3, kind: input, shape index: {}]   ;;  %s916_s4 = inlined_call_operand.vmem [shape: f32[1,128], index: 4, kind: input, shape index: {}]   ;;  %s917_s5 = inlined_call_operand.hbm [shape: f32[96,128], index: 5, kind: output, shape index: {}]  }
   0x1   :  { %v627_v0 = vld [vmem:[%s913_s1] sm:$0xff]   ;;  %v628_v1 = vld [vmem:[%s913_s1 + $0x8] sm:$0xff]   ;;  %v629_v2 = vld [vmem:[%s913_s1 + $0x10] sm:$0xff]  }
   0x2   :  { %568 = vmatprep.subr.bf16.mxu0 %v627_v0  ;;  %v630_v3 = vld [vmem:[%s913_s1 + $0x18] sm:$0xff]   ;;  %v635_v4 = vld [vmem:[%s912_s0] sm:$0xff]   ;;  %v632_v6 = vld [vmem:[%s913_s1 + $0x28] sm:$0xff]  }
   0x3   :  { %569 = vmatpush3.bf16.msra.mxu0 %v627_v0  ;;  %584 = vmatprep.mubr.bf16.mxu0 %v635_v4  ;;  %v631_v5 = vld [vmem:[%s913_s1 + $0x20] sm:$0xff]  }
   0x4   :  { %570 = vmatprep.subr.bf16.mxu0 %v628_v1 }
   0x7   :  { %571 = vmatpush3.bf16.msra.mxu0 %v628_v1 }
   0x8   :  { %572 = vmatprep.subr.bf16.mxu0 %v629_v2 }
   0xb   :  { %573 = vmatpush3.bf16.msra.mxu0 %v629_v2 }
   0xc   :  { %574 = vmatprep.subr.bf16.mxu0 %v630_v3 }
   0xf   :  { %575 = vmatpush3.bf16.msra.mxu0 %v630_v3 }
  0x10   :  { %576 = vmatprep.subr.bf16.mxu0 %v631_v5 }
  0x13   :  { %577 = vmatpush3.bf16.msra.mxu0 %v631_v5 }
  0x14   :  { %10 = vsyncpa [#allocation3], 0  ;;  %578 = vmatprep.subr.bf16.mxu0 %v632_v6  ;;  %v633_v7 = vld [vmem:[%s913_s1 + $0x30] sm:$0xff]   ;;  %v634_v8 = vld [vmem:[%s913_s1 + $0x38] sm:$0xff]  }
  0x15   :  { %v636_v9 = vld [vmem:[%s912_s0 + $0x8] sm:$0xff]   ;;  %v637_v10 = vld [vmem:[%s912_s0 + $0x10] sm:$0xff]   ;;  %v638_v11 = vld [vmem:[%s912_s0 + $0x18] sm:$0xff]  }
  0x16   :  { %v639_v12 = vld [vmem:[%s912_s0 + $0x20] sm:$0xff]   ;;  %v640_v13 = vld [vmem:[%s912_s0 + $0x28] sm:$0xff]   ;;  %v643_v16 = vld [vmem:[%s915_s3 + $0x10] sm:$0xff]  }
  0x17   :  { %579 = vmatpush3.bf16.msra.mxu0 %v632_v6  ;;  %v641_v14 = vld [vmem:[%s915_s3] sm:$0xff]   ;;  %v642_v15 = vld [vmem:[%s915_s3 + $0x8] sm:$0xff]   ;;  %v644_v17 = vld [vmem:[%s915_s3 + $0x18] sm:$0xff]  }
  0x18   :  { %580 = vmatprep.subr.bf16.mxu0 %v633_v7  ;;  %596 = vmatprep.subr.bf16.mxu1 %v641_v14  ;;  %v645_v18 = vld [vmem:[%s915_s3 + $0x20] sm:$0xff]   ;;  %v646_v19 = vld [vmem:[%s915_s3 + $0x28] sm:$0xff]   ;;  %v647_v20 = vld [vmem:[%s915_s3 + $0x30] sm:$0xff]  }
  0x19   :  { %597 = vmatpush3.bf16.msra.mxu1 %v641_v14  ;;  %v648_v21 = vld [vmem:[%s915_s3 + $0x38] sm:$0xff]   ;;  %v799_v22 = vld [vmem:[%s914_s2] ss:$0 sm:$0xff] }
  0x1a   :  { %598 = vmatprep.subr.bf16.mxu1 %v642_v15 }
  0x1b   :  { %581 = vmatpush3.bf16.msra.mxu0 %v633_v7 }
  0x1c   :  { %582 = vmatprep.subr.bf16.mxu0 %v634_v8 }
  0x1d   :  { %599 = vmatpush3.bf16.msra.mxu1 %v642_v15 }
  0x1e   :  { %600 = vmatprep.subr.bf16.mxu1 %v643_v16 }
  0x1f   :  { %583 = vmatpush3.bf16.msra.mxu0 %v634_v8 }
  0x21   :  { %601 = vmatpush3.bf16.msra.mxu1 %v643_v16 }
  0x22   :  { %585 = vmatmul.mubr.bf16.vlgmr.msra.gmra.mrb[0].mxu0 %v636_v9  ;;  %602 = vmatprep.subr.bf16.mxu1 %v644_v17 }
  0x23   :  { %588 = vmatprep.mubr.bf16.mxu0 %v637_v10 }
  0x25   :  { %603 = vmatpush3.bf16.msra.mxu1 %v644_v17 }
  0x26   :  { %604 = vmatprep.subr.bf16.mxu1 %v645_v18 }
  0x29   :  { %605 = vmatpush3.bf16.msra.mxu1 %v645_v18 }
  0x2a   :  { %589 = vmatmul.mubr.bf16.gmra.mrb[4].mxu0 %v638_v11  ;;  %606 = vmatprep.subr.bf16.mxu1 %v646_v19 }
  0x2b   :  { %592 = vmatprep.mubr.bf16.mxu0 %v639_v12 }
  0x2d   :  { %607 = vmatpush3.bf16.msra.mxu1 %v646_v19 }
  0x2e   :  { %608 = vmatprep.subr.bf16.mxu1 %v647_v20 }
  0x31   :  { %609 = vmatpush3.bf16.msra.mxu1 %v647_v20 }
  0x32   :  { %593 = vmatmul.mubr.bf16.gmra.mrb[8].mxu0 %v640_v13  ;;  %610 = vmatprep.subr.bf16.mxu1 %v648_v21 }
  0x35   :  { %611 = vmatpush3.bf16.msra.mxu1 %v648_v21 }
  0xf5   :  { %v586_v23 = vpop.f32.mrb[0].mxu0 }
  0xf6   :  { %v802_v24 = vadd.f32 %v586_v23, %v799_v22  ;;  %v175_v25 = vpop.f32.mrb[1].mxu0 }
  0xf7   :  { %v805_v26 = vadd.f32 %v799_v22, %v175_v25  ;;  %v587_v27 = vpop.f32.mrb[2].mxu0 }
  0xf8   :  { %v236_v28 = vmul.f32 %v802_v24, %v802_v24  ;;  %v810_v29 = vadd.f32 %v587_v27, %v799_v22  ;;  %v178_v30 = vpop.f32.mrb[3].mxu0 }
  0xf9   :  { %v234_v31 = vmul.f32 %v805_v26, %v805_v26  ;;  %v815_v32 = vadd.f32 %v799_v22, %v178_v30 }
  0xfa   :  { %v248_v33 = vmul.f32 %v236_v28, %v802_v24  ;;  %v237_v34 = vmul.f32 %v810_v29, %v810_v29 }
  0xfb   :  { %v246_v35 = vmul.f32 %v234_v31, %v805_v26  ;;  %v235_v36 = vmul.f32 %v815_v32, %v815_v32 }
  0xfc   :  { %v260_v37 = vmul.f32 0.044715, %v248_v33  ;;  %v249_v38 = vmul.f32 %v237_v34, %v810_v29 }
  0xfd   :  { %v258_v39 = vmul.f32 0.044715, %v246_v35  ;;  %v247_v40 = vmul.f32 %v235_v36, %v815_v32  ;;  %v590_v41 = vpop.f32.mrb[4].mxu0  ;;  %v224_v36 = vmul.f32 0.5, %v802_v24 }
  0xfe   :  { %v272_v42 = vadd.f32 %v260_v37, %v802_v24  ;;  %v261_v43 = vmul.f32 0.044715, %v249_v38  ;;  %v827_v44 = vadd.f32 %v590_v41, %v799_v22  ;;  %v191_v45 = vpop.f32.mrb[5].mxu0 }
  0xff   :  { %v259_v46 = vmul.f32 0.044715, %v247_v40  ;;  %v830_v47 = vadd.f32 %v799_v22, %v191_v45  ;;  %v591_v48 = vpop.f32.mrb[6].mxu0  ;;  %v270_v49 = vadd.f32 %v258_v39, %v805_v26  ;;  %v222_v45 = vmul.f32 0.5, %v805_v26 }
 0x100   :  { %v284_v50 = vmul.f32 0.7978846, %v272_v42  ;;  %v273_v51 = vadd.f32 %v261_v43, %v810_v29  ;;  %v240_v52 = vmul.f32 %v827_v44, %v827_v44  ;;  %v837_v53 = vadd.f32 %v591_v48, %v799_v22  ;;  %v194_v54 = vpop.f32.mrb[7].mxu0 }
 0x101   :  { %v238_v55 = vmul.f32 %v830_v47, %v830_v47  ;;  %v842_v56 = vadd.f32 %v799_v22, %v194_v54  ;;  %v271_v57 = vadd.f32 %v259_v46, %v815_v32  ;;  %v282_v58 = vmul.f32 0.7978846, %v270_v49 }
 0x102   :  { %649 = vtanh.f32 %v284_v50  ;;  %v285_v59 = vmul.f32 0.7978846, %v273_v51  ;;  %v252_v60 = vmul.f32 %v240_v52, %v827_v44  ;;  %v241_v61 = vmul.f32 %v837_v53, %v837_v53 }
 0x103   :  { %v250_v62 = vmul.f32 %v238_v55, %v830_v47  ;;  %v239_v63 = vmul.f32 %v842_v56, %v842_v56  ;;  %v283_v0 = vmul.f32 0.7978846, %v271_v57  ;;  %651 = vtanh.f32 %v282_v58 }
 0x104   :  { %653 = vtanh.f32 %v285_v59  ;;  %v264_v1 = vmul.f32 0.044715, %v252_v60  ;;  %v253_v2 = vmul.f32 %v241_v61, %v837_v53  ;;  %v225_v51 = vmul.f32 0.5, %v810_v29 }
 0x105   :  { %v262_v3 = vmul.f32 0.044715, %v250_v62  ;;  %v251_v4 = vmul.f32 %v239_v63, %v842_v56  ;;  %v594_v5 = vpop.f32.mrb[8].mxu0  ;;  %655 = vtanh.f32 %v283_v0  ;;  %v223_v55 = vmul.f32 0.5, %v815_v32 }
 0x106   :  { %v276_v6 = vadd.f32 %v264_v1, %v827_v44  ;;  %v265_v7 = vmul.f32 0.044715, %v253_v2  ;;  %v855_v8 = vadd.f32 %v594_v5, %v799_v22  ;;  %v207_v9 = vpop.f32.mrb[9].mxu0 }
 0x107   :  { %v274_v10 = vadd.f32 %v262_v3, %v830_v47  ;;  %v263_v11 = vmul.f32 0.044715, %v251_v4  ;;  %v859_v12 = vadd.f32 %v799_v22, %v207_v9  ;;  %v595_v13 = vpop.f32.mrb[10].mxu0  ;;  %v229_v9 = vmul.f32 0.5, %v837_v53 }
 0x108   :  { %v288_v14 = vmul.f32 0.7978846, %v276_v6  ;;  %v277_v15 = vadd.f32 %v265_v7, %v837_v53  ;;  %v244_v16 = vmul.f32 %v855_v8, %v855_v8  ;;  %v865_v17 = vadd.f32 %v595_v13, %v799_v22  ;;  %v210_v18 = vpop.f32.mrb[11].mxu0 }
 0x109   :  { %v286_v19 = vmul.f32 0.7978846, %v274_v10  ;;  %v275_v20 = vadd.f32 %v263_v11, %v842_v56  ;;  %v242_v21 = vmul.f32 %v859_v12, %v859_v12  ;;  %v871_v23 = vadd.f32 %v799_v22, %v210_v18 }
 0x10a   :  { %657 = vtanh.f32 %v288_v14  ;;  %v289_v25 = vmul.f32 0.7978846, %v277_v15  ;;  %v256_v27 = vmul.f32 %v244_v16, %v855_v8  ;;  %v245_v28 = vmul.f32 %v865_v17, %v865_v17 }
 0x10b   :  { %659 = vtanh.f32 %v286_v19  ;;  %v287_v30 = vmul.f32 0.7978846, %v275_v20  ;;  %v254_v31 = vmul.f32 %v242_v21, %v859_v12  ;;  %v243_v33 = vmul.f32 %v871_v23, %v871_v23 }
 0x10c   :  { %v650_v34 = vpop.eup %649  ;;  %661 = vtanh.f32 %v289_v25  ;;  %v268_v35 = vmul.f32 0.044715, %v256_v27  ;;  %v257_v22 = vmul.f32 %v245_v28, %v865_v17  ;;  %v228_v7 = vmul.f32 0.5, %v827_v44 }
 0x10d   :  { %v652_v37 = vpop.eup %651  ;;  %663 = vtanh.f32 %v287_v30  ;;  %v266_v38 = vmul.f32 0.044715, %v254_v31  ;;  %v255_v39 = vmul.f32 %v243_v33, %v871_v23  ;;  %v308_v40 = vadd.f32 1.0, %v650_v34 }
 0x10e   :  { %v654_v41 = vpop.eup %653  ;;  %v280_v42 = vadd.f32 %v268_v35, %v855_v8  ;;  %v269_v43 = vmul.f32 0.044715, %v257_v22  ;;  %v306_v46 = vadd.f32 1.0, %v652_v37  ;;  %v226_v11 = vmul.f32 0.5, %v830_v47 }
 0x10f   :  { %v656_v48 = vpop.eup %655  ;;  %v278_v49 = vadd.f32 %v266_v38, %v859_v12  ;;  %v267_v50 = vmul.f32 0.044715, %v255_v39  ;;  %v309_v24 = vadd.f32 1.0, %v654_v41  ;;  %v320_v60 = vmul.f32 %v308_v40, %v224_v36 }
 0x110   :  { %v292_v52 = vmul.f32 0.7978846, %v280_v42  ;;  %v281_v54 = vadd.f32 %v269_v43, %v865_v17  ;;  %v307_v57 = vadd.f32 1.0, %v656_v48  ;;  %v318_v62 = vmul.f32 %v306_v46, %v222_v45 }
 0x111   :  { %v290_v58 = vmul.f32 0.7978846, %v278_v49  ;;  %v279_v59 = vadd.f32 %v267_v50, %v871_v23  ;;  %v321_v61 = vmul.f32 %v309_v24, %v225_v51  ;;  %v227_v13 = vmul.f32 0.5, %v842_v56 }
 0x112   :  { %665 = vtanh.f32 %v292_v52  ;;  %v293_v26 = vmul.f32 0.7978846, %v281_v54  ;;  %v319_v63 = vmul.f32 %v307_v57, %v223_v55  ;;  %v232_v53 = vmul.f32 0.5, %v855_v8  ;;  %v531_v8 = vld [vmem:[%s916_s4] ss:$0 sm:$0xff]  ;;  %s697_s4 = smov [#allocation2]  }
 0x113   :  { %667 = vtanh.f32 %v290_v58  ;;  %v291_v0 = vmul.f32 0.7978846, %v279_v59  ;;  %v331_v1 = vpack.c.bf16 %v321_v61, %v320_v60  ;;  %v233_v47 = vmul.f32 0.5, %v865_v17  ;;  %s505_s12 = sshll.u32 %s697_s4, 4  ;;  %s506_s12 = int_to_ptr.vmem [resolvable:$true] %s505_s12 }
 0x114   :  { %v658_v29 = vpop.eup %657  ;;  %669 = vtanh.f32 %v293_v26  ;;  %v330_v2 = vpack.c.bf16 %v319_v63, %v318_v62  ;;  %v230_v33 = vmul.f32 0.5, %v859_v12  ;;  %v231_v34 = vmul.f32 0.5, %v871_v23  ;;  %s673_s13 = scalar_lea.vmem %s506_s12, 1536  ;;  %p678_p1 = scmp.lt.s32.totalorder %s506_s12, %s506_s12 }
 0x115   :  { %v660_v3 = vpop.eup %659  ;;  %671 = vtanh.f32 %v291_v0  ;;  %v312_v4 = vadd.f32 1.0, %v658_v29  ;;  %p674_p0 = scmp.ne.s32.totalorder %s506_s12, %s673_s13  ;;  %p679_p2 = scmp.lt.s32.totalorder %s673_s13, %s673_s13 }
 0x116   :  { %v662_v32 = vpop.eup %661  ;;  %612 = vmatprep.mubr.bf16.mxu1 %v330_v2  ;;  %v310_v5 = vadd.f32 1.0, %v660_v3 }
 0x117   :  { %v664_v6 = vpop.eup %663  ;;  %613 = vmatmul.mubr.bf16.vlgmr.msra.gmra.mrb[0].mxu1 %v331_v1  ;;  %v313_v10 = vadd.f32 1.0, %v662_v32  ;;  %v324_v15 = vmul.f32 %v312_v4, %v228_v7  ;;  %p680_p3 = por %p679_p2, %p678_p1 }
 0x118   :  { %v311_v14 = vadd.f32 1.0, %v664_v6  ;;  %v322_v18 = vmul.f32 %v310_v5, %v226_v11 }
 0x119   :  { %v325_v16 = vmul.f32 %v313_v10, %v229_v9  ;;  %p681_p4 = pnand %p680_p3, %p674_p0 }
 0x11a   :  { %v323_v19 = vmul.f32 %v311_v14, %v227_v13 }
 0x11b   :  { %v333_v20 = vpack.c.bf16 %v325_v16, %v324_v15 }
 0x11c   :  { %v666_v21 = vpop.eup %665  ;;  %v332_v25 = vpack.c.bf16 %v323_v19, %v322_v18 }
 0x11d   :  { %v668_v27 = vpop.eup %667  ;;  %v316_v28 = vadd.f32 1.0, %v666_v21 }
 0x11e   :  { %v670_v30 = vpop.eup %669  ;;  %616 = vmatprep.mubr.bf16.mxu1 %v332_v25  ;;  %v314_v44 = vadd.f32 1.0, %v668_v27 }
 0x11f   :  { %v672_v31 = vpop.eup %671  ;;  %617 = vmatmul.mubr.bf16.gmra.mrb[4].mxu1 %v333_v20  ;;  %v317_v56 = vadd.f32 1.0, %v670_v30  ;;  %v328_v22 = vmul.f32 %v316_v28, %v232_v53 }
 0x120   :  { %v315_v35 = vadd.f32 1.0, %v672_v31  ;;  %v326_v37 = vmul.f32 %v314_v44, %v230_v33 }
 0x121   :  { %v329_v36 = vmul.f32 %v317_v56, %v233_v47 }
 0x122   :  { %v327_v38 = vmul.f32 %v315_v35, %v231_v34 }
 0x123   :  { %v335_v39 = vpack.c.bf16 %v329_v36, %v328_v22 }
 0x124   :  { %v334_v40 = vpack.c.bf16 %v327_v38, %v326_v37 }
 0x126   :  { %620 = vmatprep.mubr.bf16.mxu1 %v334_v40 }
 0x127   :  { %621 = vmatmul.mubr.bf16.gmra.mrb[8].mxu1 %v335_v39 }
 0x1ea   :  { %v614_v41 = vpop.f32.mrb[0].mxu1 }
 0x1eb   :  { %v450_v17 = vadd.f32 %v614_v41, %v531_v8  ;;  %v441_v42 = vpop.f32.mrb[1].mxu1 }
 0x1ec   :  { %v442_v43 = vadd.f32 %v531_v8, %v441_v42  ;;  %v615_v12 = vpop.f32.mrb[2].mxu1 }
 0x1ed   :  { %490 = vst [vmem:[#allocation2 + $0x10] sm:$0xff] %v450_v17  ;;  %v453_v23 = vadd.f32 %v615_v12, %v531_v8  ;;  %v444_v45 = vpop.f32.mrb[3].mxu1 }
 0x1ee   :  { %488 = vst [vmem:[#allocation2] sm:$0xff] %v442_v43  ;;  %v445_v46 = vadd.f32 %v531_v8, %v444_v45 }
 0x1ef   :  { %491 = vst [vmem:[#allocation2 + $0x18] sm:$0xff] %v453_v23 }
 0x1f0   :  { %489 = vst [vmem:[#allocation2 + $0x8] sm:$0xff] %v445_v46 }
 0x1f2   :  { %v618_v48 = vpop.f32.mrb[4].mxu1 }
 0x1f3   :  { %v466_v49 = vadd.f32 %v618_v48, %v531_v8  ;;  %v457_v50 = vpop.f32.mrb[5].mxu1 }
 0x1f4   :  { %v458_v51 = vadd.f32 %v531_v8, %v457_v50  ;;  %v619_v24 = vpop.f32.mrb[6].mxu1 }
 0x1f5   :  { %494 = vst [vmem:[#allocation2 + $0x30] sm:$0xff] %v466_v49  ;;  %v469_v52 = vadd.f32 %v619_v24, %v531_v8  ;;  %v460_v54 = vpop.f32.mrb[7].mxu1 }
 0x1f6   :  { %492 = vst [vmem:[#allocation2 + $0x20] sm:$0xff] %v458_v51  ;;  %v461_v55 = vadd.f32 %v531_v8, %v460_v54 }
 0x1f7   :  { %495 = vst [vmem:[#allocation2 + $0x38] sm:$0xff] %v469_v52 }
 0x1f8   :  { %493 = vst [vmem:[#allocation2 + $0x28] sm:$0xff] %v461_v55 }
 0x1fa   :  { %v622_v57 = vpop.f32.mrb[8].mxu1 }
 0x1fb   :  { %v482_v58 = vadd.f32 %v622_v57, %v531_v8  ;;  %v473_v59 = vpop.f32.mrb[9].mxu1 }
 0x1fc   :  { %v474_v60 = vadd.f32 %v531_v8, %v473_v59  ;;  %v623_v61 = vpop.f32.mrb[10].mxu1 }
 0x1fd   :  { %498 = vst [vmem:[#allocation2 + $0x50] sm:$0xff] %v482_v58  ;;  %v485_v26 = vadd.f32 %v623_v61, %v531_v8  ;;  %v476_v62 = vpop.f32.mrb[11].mxu1 }
 0x1fe   :  { %496 = vst [vmem:[#allocation2 + $0x40] sm:$0xff] %v474_v60  ;;  %v477_v63 = vadd.f32 %v531_v8, %v476_v62 }
 0x1ff   :  { %499 = vst [vmem:[#allocation2 + $0x58] sm:$0xff] %v485_v26 }
 0x200   :  { %497 = vst [vmem:[#allocation2 + $0x48] sm:$0xff] %v477_v63 }
 0x201   :  { %684 = shalt.err (!%p681_p4)
}
 0x202   :  { %s685_s16 = scalar_lea.hbm %s917_s5, 1536 }
 0x203   :  { %p686_p5 = scmp.ne.s32.totalorder %s917_s5, %s685_s16  ;;  %p689_p6 = scmp.lt.u32.totalorder %s685_s16, %s917_s5 }
 0x205   :  { %p691_p7 = pnand %p689_p6, %p686_p5 }
 0x207   :  { %694 = shalt.err (!%p691_p7)
}
 0x208   :  { %s698_s20 = smov 128   ;;  %s699_s21 = smov 8  }
 0x209   :  { %511 = dma.vmem_to_hbm [thread:$0]  %s506_s12, 1536, %s917_s5, [#allocation3], %s698_s20, %s698_s20, %s699_s21  }
 0x20a   :  { %695 = dma.done.wait [#allocation3], 1536  }
 0x20b   :  { %696 = vsyncadd [#allocation3], 4294965760 }
 0x20c   :  { %515 = vsyncpa [#allocation3], 1 }

</bundles_post_ra>
